<compile_context>
chip_gen: v6e
topology: v6e:2x2x1
jax: 0.10.0
libtpu: 0.0.40
codegen_flags: <defaults>
</compile_context>

<pallas_src>
import functools

import jax
import jax.numpy as jnp
from jax.experimental import pallas as pl
from jax.experimental.pallas import tpu as pltpu


def _static_pow(base, gamma):
    """(base)^gamma with gamma known at trace time; small integer gammas become
    repeated multiplies (no EUP log+exp)."""
    g = float(gamma)
    if g == 0.0:
        return jnp.ones_like(base)
    if g == int(g) and 1 <= int(g) <= 8:
        gi = int(g)
        result = None
        acc = base
        while gi:
            if gi & 1:
                result = acc if result is None else result * acc
            gi >>= 1
            if gi:
                acc = acc * acc
        return result
    return jnp.power(base, g)


def _reg_focal_kernel(logit_ref, reg_ref, tgt_ref, rt_ref, o_ref, *,
                      alpha, gamma, eps, norm, approx_recip):
    # logit_ref/reg_ref: (Nb, C, TP)   tgt_ref/rt_ref/o_ref: (Nb, 1, TP)
    x = logit_ref[...].astype(jnp.float32)            # (Nb, C, TP) logits (f32)
    t = tgt_ref[...]                                   # (Nb, 1, TP) int32 labels
    rt = rt_ref[...].astype(jnp.float32)               # (Nb, 1, TP) regression targets

    # Numerically-stable softmax over the class (sublane) axis.
    # p itself is never materialized: focal weight built straight from ez * 1/s.
    m = jnp.max(x, axis=1, keepdims=True)               # (Nb, 1, TP)
    ez = jnp.exp(x - m)                                  # (Nb, C, TP)
    inv_s = pl.reciprocal(jnp.sum(ez, axis=1, keepdims=True),
                          approx=approx_recip)           # (Nb, 1, TP)
    w = _static_pow(1.0 - ez * inv_s, gamma)             # (1 - p)^gamma, (Nb, C, TP)

    # one_hot(target): compare class index (sublane iota) against the label.
    cls = jax.lax.broadcasted_iota(jnp.int32, x.shape, 1)  # (Nb, C, TP)
    onehot = cls == t                                       # (Nb, C, TP) bool

    # Gather the regression prediction at the target class in the INPUT dtype
    # (exact: single nonzero term), then upcast only the (Nb,1,TP) result.
    input_value = jnp.sum(jnp.where(onehot, reg_ref[...], 0),
                          axis=1, keepdims=True).astype(jnp.float32)  # (Nb, 1, TP)

    diff = input_value - rt
    if norm == "l1":
        norm_loss = jnp.abs(diff)
    else:  # 'l2'
        norm_loss = diff * diff

    # Fused tail reduction:
    #   loss_weight = sum_c (1 - p_c)^gamma * (onehot_c + eps)
    #               = (1 - p_t)^gamma + eps * sum_c (1 - p_c)^gamma
    lw = jnp.sum(w * (onehot.astype(jnp.float32) + eps),
                 axis=1, keepdims=True)                   # (Nb, 1, TP)

    o_ref[...] = (alpha * norm_loss * lw).astype(o_ref.dtype)


def regression_focal_loss_pallas(logit, reg_input, logit_target, regression_target,
                                 *, alpha, gamma=2.0, norm="l1", reduction="none",
                                 eps=1e-6, tile_pixels=16384,
                                 vmem_budget_bytes=40 * 1024 * 1024,
                                 approx_reciprocal=False):
    """logit/reg_input: (N, C, H, W); logit_target/regression_target: (N, H, W).

    Inputs may be f32 or bf16 (kept in their HBM dtype; upcast in VMEM).
    """
    if norm not in ("l1", "l2"):
        raise NotImplementedError(f'Invalid norm type "{norm}". Expected "l1" or "l2".')

    N, C, H, W = logit.shape
    HW = H * W

    # Pure views (no data movement): pixels land on the lane axis, C on sublanes.
    x = logit.reshape(N, C, HW)
    r = reg_input.reshape(N, C, HW)
    t = logit_target.reshape(N, 1, HW).astype(jnp.int32)
    rt = regression_target.reshape(N, 1, HW)

    # --- tile selection -----------------------------------------------------
    l_item = jnp.dtype(logit.dtype).itemsize
    r_item = jnp.dtype(reg_input.dtype).itemsize
    rt_item = jnp.dtype(regression_target.dtype).itemsize
    # bytes per pixel: double-buffered blocks (2 big inputs + labels + target +
    # output) plus ~6 live (C,TP)-sized f32 temporaries inside the kernel.
    per_px = 2 * (C * (l_item + r_item) + 4 + rt_item + 4) + 6 * C * 4

    # Pixel tile: multiple of 128 (lane-dense, unmasked vst) or the full HW dim.
    max_tp = max(128, (int(vmem_budget_bytes) // per_px) // 128 * 128)
    tp = min(int(tile_pixels), max_tp)
    tp = max(128, (tp // 128) * 128)
    if tp >= HW:
        tp = HW  # full extent (allowed even when not a multiple of 128)

    num_p = pl.cdiv(HW, tp)

    # If the whole image fits in one pixel tile, block several batch rows per
    # step instead of shrinking tiles; keep >= 2 grid programs so the v7x
    # megacore can shard the (parallel) grid axes.
    nb = 1
    if num_p == 1 and N > 1:
        nb = min(max(1, N // 2),
                 max(1, int(tile_pixels) // max(HW, 1)),
                 max(1, int(vmem_budget_bytes) // max(per_px * HW, 1)))
        nb = max(nb, 1)

    grid = (pl.cdiv(N, nb), num_p)

    # Explicit scoped-VMEM limit: enough for this tiling, capped at 64 MiB so
    # the same setting is valid on v7x (64 MiB physical) and v5e/v6e (128 MiB).
    vmem_limit = int(min(64 * 1024 * 1024,
                         max(32 * 1024 * 1024, 1.25 * nb * tp * per_px)))

    kernel = functools.partial(_reg_focal_kernel, alpha=float(alpha),
                               gamma=float(gamma), eps=float(eps), norm=norm,
                               approx_recip=bool(approx_reciprocal))

    loss3 = pl.pallas_call(
        kernel,
        out_shape=jax.ShapeDtypeStruct((N, 1, HW), jnp.float32),
        grid_spec=pltpu.PrefetchScalarGridSpec(
            num_scalar_prefetch=0,
            grid=grid,
            in_specs=[
                pl.BlockSpec((nb, C, tp), lambda n, p: (n, 0, p)),   # logits
                pl.BlockSpec((nb, C, tp), lambda n, p: (n, 0, p)),   # regression preds
                pl.BlockSpec((nb, 1, tp), lambda n, p: (n, 0, p)),   # labels
                pl.BlockSpec((nb, 1, tp), lambda n, p: (n, 0, p)),   # regression targets
            ],
            out_specs=pl.BlockSpec((nb, 1, tp), lambda n, p: (n, 0, p)),
        ),
        compiler_params=pltpu.CompilerParams(
            dimension_semantics=("parallel", "parallel"),
            vmem_limit_bytes=vmem_limit),
    )(x, r, t, rt)

    loss = loss3.reshape(N, H, W)

    if reduction == "none":
        return loss
    elif reduction == "mean":
        return jnp.mean(loss)
    elif reduction == "sum":
        return jnp.sum(loss)
    else:
        raise NotImplementedError(f"Invalid reduction mode: {reduction}")


class RegressionFocalLossPallas:
    """Mirror of the PyTorch RegressionFocalLoss module (no learned parameters)."""

    def __init__(self, alpha, gamma=2.0, norm="l1", reduction="none"):
        self.alpha = alpha
        self.gamma = gamma
        self.norm = norm
        self.reduction = reduction

    def __call__(self, logit, reg_input, logit_target, regression_target):
        return regression_focal_loss_pallas(
            logit, reg_input, logit_target, regression_target,
            alpha=self.alpha, gamma=self.gamma, norm=self.norm,
            reduction=self.reduction)


def _regression_focal_loss_ref(logit, reg_input, logit_target, regression_target,
                               alpha, gamma=2.0, norm="l1", eps=1e-6):
    # Pure-JAX reference mirroring the PyTorch code path, for correctness checks.
    p = jax.nn.softmax(logit.astype(jnp.float32), axis=1)
    C = logit.shape[1]
    input_value = jnp.take_along_axis(
        reg_input.astype(jnp.float32), logit_target[:, None, :, :], axis=1)[:, 0]
    if norm == "l1":
        norm_loss = jnp.abs(input_value - regression_target.astype(jnp.float32))
    else:
        norm_loss = (input_value - regression_target.astype(jnp.float32)) ** 2
    onehot = jnp.transpose(jax.nn.one_hot(logit_target, C, dtype=jnp.float32),
                           (0, 3, 1, 2)) + eps
    weight = jnp.power(1.0 - p, gamma)
    focal = alpha * weight * norm_loss[:, None, :, :]
    return jnp.einsum("bchw,bchw->bhw", onehot, focal)


if __name__ == "__main__":
    key = jax.random.PRNGKey(0)
    k1, k2, k3, k4 = jax.random.split(key, 4)

    N, C, H, W = 2, 5, 16, 16
    logit = jax.random.normal(k1, (N, C, H, W), dtype=jnp.float32)
    reg_input = jax.random.normal(k2, (N, C, H, W), dtype=jnp.float32)
    logit_target = jax.random.randint(k3, (N, H, W), 0, C, dtype=jnp.int32)
    regression_target = jax.random.normal(k4, (N, H, W), dtype=jnp.float32)

    # norm='l1', reduction='none' (module defaults)
    criterion = RegressionFocalLossPallas(alpha=0.25, gamma=2.0, norm="l1",
                                          reduction="none")
    loss = jax.block_until_ready(
        criterion(logit, reg_input, logit_target, regression_target))
    ref = _regression_focal_loss_ref(logit, reg_input, logit_target,
                                     regression_target, alpha=0.25, gamma=2.0,
                                     norm="l1")
    assert loss.shape == (N, H, W)
    assert jnp.allclose(loss, ref, atol=1e-5, rtol=1e-5), \
        f"l1/none max err {jnp.max(jnp.abs(loss - ref))}"

    # norm='l2', reduction='mean' (scalar reduction applied outside the kernel)
    crit2 = RegressionFocalLossPallas(alpha=0.5, gamma=2.0, norm="l2",
                                      reduction="mean")
    out2 = jax.block_until_ready(
        crit2(logit, reg_input, logit_target, regression_target))
    ref2 = jnp.mean(_regression_focal_loss_ref(logit, reg_input, logit_target,
                                               regression_target, alpha=0.5,
                                               gamma=2.0, norm="l2"))
    assert jnp.allclose(out2, ref2, atol=1e-5, rtol=1e-5), \
        f"l2/mean err {jnp.abs(out2 - ref2)}"

    # multi-tile path with a partial trailing pixel tile (HW not a multiple of 128)
    k5, k6, k7, k8 = jax.random.split(jax.random.PRNGKey(0), 4)
    N3, C3, H3, W3 = 1, 4, 20, 20
    lg3 = jax.random.normal(k5, (N3, C3, H3, W3), dtype=jnp.float32)
    rg3 = jax.random.normal(k6, (N3, C3, H3, W3), dtype=jnp.float32)
    tg3 = jax.random.randint(k7, (N3, H3, W3), 0, C3, dtype=jnp.int32)
    rt3 = jax.random.normal(k8, (N3, H3, W3), dtype=jnp.float32)
    out3 = jax.block_until_ready(regression_focal_loss_pallas(
        lg3, rg3, tg3, rt3, alpha=0.25, gamma=2.0, norm="l1", reduction="none",
        tile_pixels=128))
    ref3 = _regression_focal_loss_ref(lg3, rg3, tg3, rt3, alpha=0.25, gamma=2.0,
                                      norm="l1")
    assert jnp.allclose(out3, ref3, atol=1e-5, rtol=1e-5), \
        f"multi-tile max err {jnp.max(jnp.abs(out3 - ref3))}"

    print("KERNEL_OK")
</pallas_src>

<mosaic_0001>
module attributes {stable_mosaic.version = 11 : i64} {
  func.func @_reg_focal_kernel(%arg0: i32, %arg1: i32, %arg2: memref<1x5x256xf32, #tpu.memory_space<vmem>>, %arg3: memref<1x5x256xf32, #tpu.memory_space<vmem>>, %arg4: memref<1x1x256xi32, #tpu.memory_space<vmem>>, %arg5: memref<1x1x256xf32, #tpu.memory_space<vmem>>, %arg6: memref<1x1x256xf32, #tpu.memory_space<vmem>>) attributes {dimension_semantics = [#tpu.dimension_semantics<parallel>, #tpu.dimension_semantics<parallel>], iteration_bounds = array<i64: 2, 1>, scalar_prefetch = 0 : i64, scratch_operands = 0 : i64, tpu.core_type = #tpu.core_type<tc>, window_params = [{transform_indices = @transform_0, window_bounds = array<i64: 1, 5, 256>}, {transform_indices = @transform_1, window_bounds = array<i64: 1, 5, 256>}, {transform_indices = @transform_2, window_bounds = array<i64: 1, 1, 256>}, {transform_indices = @transform_3, window_bounds = array<i64: 1, 1, 256>}, {transform_indices = @transform_4, window_bounds = array<i64: 1, 1, 256>}]} {
    %c0 = arith.constant 0 : index
    %c0_0 = arith.constant 0 : index
    %c0_1 = arith.constant 0 : index
    %0 = vector.load %arg2[%c0, %c0_0, %c0_1] : memref<1x5x256xf32, #tpu.memory_space<vmem>>, vector<1x5x256xf32>
    %c0_2 = arith.constant 0 : index
    %c0_3 = arith.constant 0 : index
    %c0_4 = arith.constant 0 : index
    %1 = vector.load %arg4[%c0_2, %c0_3, %c0_4] : memref<1x1x256xi32, #tpu.memory_space<vmem>>, vector<1x1x256xi32>
    %c0_5 = arith.constant 0 : index
    %c0_6 = arith.constant 0 : index
    %c0_7 = arith.constant 0 : index
    %2 = vector.load %arg5[%c0_5, %c0_6, %c0_7] : memref<1x1x256xf32, #tpu.memory_space<vmem>>, vector<1x1x256xf32>
    %cst = arith.constant dense<0xFF800000> : vector<1x256xf32>
    %3 = vector.multi_reduction <maximumf>, %0, %cst [1] : vector<1x5x256xf32> to vector<1x256xf32>
    %4 = vector.shape_cast %3 : vector<1x256xf32> to vector<1x1x256xf32>
    %5 = vector.broadcast %4 : vector<1x1x256xf32> to vector<1x5x256xf32>
    %6 = arith.subf %0, %5 : vector<1x5x256xf32>
    %7 = math.exp %6 : vector<1x5x256xf32>
    %cst_8 = arith.constant dense<0.000000e+00> : vector<1x256xf32>
    %8 = vector.multi_reduction <add>, %7, %cst_8 [1] : vector<1x5x256xf32> to vector<1x256xf32>
    %9 = vector.shape_cast %8 : vector<1x256xf32> to vector<1x1x256xf32>
    %10 = tpu.reciprocal %9 : vector<1x1x256xf32> -> vector<1x1x256xf32>
    %11 = vector.broadcast %10 : vector<1x1x256xf32> to vector<1x5x256xf32>
    %12 = arith.mulf %7, %11 : vector<1x5x256xf32>
    %cst_9 = arith.constant 1.000000e+00 : f32
    %13 = vector.broadcast %cst_9 : f32 to vector<1x5x256xf32>
    %14 = arith.subf %13, %12 : vector<1x5x256xf32>
    %15 = arith.mulf %14, %14 : vector<1x5x256xf32>
    %16 = tpu.iota {dimensions = array<i32: 1>} : vector<1x5x256xi32>
    %17 = vector.broadcast %1 : vector<1x1x256xi32> to vector<1x5x256xi32>
    %18 = arith.cmpi eq, %16, %17 : vector<1x5x256xi32>
    %c0_10 = arith.constant 0 : index
    %c0_11 = arith.constant 0 : index
    %c0_12 = arith.constant 0 : index
    %19 = vector.load %arg3[%c0_10, %c0_11, %c0_12] : memref<1x5x256xf32, #tpu.memory_space<vmem>>, vector<1x5x256xf32>
    %c0_i32 = arith.constant 0 : i32
    %20 = arith.sitofp %c0_i32 : i32 to f32
    %21 = vector.broadcast %20 : f32 to vector<1x5x256xf32>
    %22 = arith.select %18, %19, %21 : vector<1x5x256xi1>, vector<1x5x256xf32>
    %cst_13 = arith.constant dense<0.000000e+00> : vector<1x256xf32>
    %23 = vector.multi_reduction <add>, %22, %cst_13 [1] : vector<1x5x256xf32> to vector<1x256xf32>
    %24 = vector.shape_cast %23 : vector<1x256xf32> to vector<1x1x256xf32>
    %25 = arith.subf %24, %2 : vector<1x1x256xf32>
    %26 = math.absf %25 : vector<1x1x256xf32>
    %27 = arith.extui %18 : vector<1x5x256xi1> to vector<1x5x256xi32>
    %28 = arith.sitofp %27 : vector<1x5x256xi32> to vector<1x5x256xf32>
    %cst_14 = arith.constant 9.99999997E-7 : f32
    %29 = vector.broadcast %cst_14 : f32 to vector<1x5x256xf32>
    %30 = arith.addf %28, %29 : vector<1x5x256xf32>
    %31 = arith.mulf %15, %30 : vector<1x5x256xf32>
    %cst_15 = arith.constant dense<0.000000e+00> : vector<1x256xf32>
    %32 = vector.multi_reduction <add>, %31, %cst_15 [1] : vector<1x5x256xf32> to vector<1x256xf32>
    %33 = vector.shape_cast %32 : vector<1x256xf32> to vector<1x1x256xf32>
    %cst_16 = arith.constant 2.500000e-01 : f32
    %34 = vector.broadcast %cst_16 : f32 to vector<1x1x256xf32>
    %35 = arith.mulf %34, %26 : vector<1x1x256xf32>
    %36 = arith.mulf %35, %33 : vector<1x1x256xf32>
    %c0_17 = arith.constant 0 : index
    %c0_18 = arith.constant 0 : index
    %c0_19 = arith.constant 0 : index
    %37 = vector.load %arg6[%c0_17, %c0_18, %c0_19] : memref<1x1x256xf32, #tpu.memory_space<vmem>>, vector<1x1x256xf32>
    tpu.vector_store %arg6[%c0_17, %c0_18, %c0_19], %36 {strides = array<i32>} : memref<1x1x256xf32, #tpu.memory_space<vmem>>, vector<1x1x256xf32>,
    return
  }
  func.func @transform_0(%arg0: i32, %arg1: i32) -> (i32, i32, i32) {
    %c0_i32 = arith.constant 0 : i32
    %c0_i32_0 = arith.constant 0 : i32
    return %arg0, %c0_i32, %arg1 : i32, i32, i32
  }
  func.func @transform_1(%arg0: i32, %arg1: i32) -> (i32, i32, i32) {
    %c0_i32 = arith.constant 0 : i32
    %c0_i32_0 = arith.constant 0 : i32
    return %arg0, %c0_i32, %arg1 : i32, i32, i32
  }
  func.func @transform_2(%arg0: i32, %arg1: i32) -> (i32, i32, i32) {
    %c0_i32 = arith.constant 0 : i32
    %c0_i32_0 = arith.constant 0 : i32
    return %arg0, %c0_i32, %arg1 : i32, i32, i32
  }
  func.func @transform_3(%arg0: i32, %arg1: i32) -> (i32, i32, i32) {
    %c0_i32 = arith.constant 0 : i32
    %c0_i32_0 = arith.constant 0 : i32
    return %arg0, %c0_i32, %arg1 : i32, i32, i32
  }
  func.func @transform_4(%arg0: i32, %arg1: i32) -> (i32, i32, i32) {
    %c0_i32 = arith.constant 0 : i32
    %c0_i32_0 = arith.constant 0 : i32
    return %arg0, %c0_i32, %arg1 : i32, i32, i32
  }
}

</mosaic_0001>

<bundles_post_ra>
// kernel: tpu_custom_call.1
= control target key start
LH: loop header
LB: loop body
LE: loop exit
PB: predicated region body
PF: predicated region fallthrough
CT: control target
= control target key end

     0   :  { %9 = vsyncpa [#allocation3], 0  ;;  %s949_s0 = inlined_call_operand.vmem [shape: f32[2,5,256], index: 0, kind: input, shape index: {}]   ;;  %s950_s1 = inlined_call_operand.vmem [shape: f32[2,5,256], index: 1, kind: input, shape index: {}]   ;;  %s951_s2 = inlined_call_operand.vmem [shape: s32[2,1,256], index: 2, kind: input, shape index: {}]   ;;  %s952_s3 = inlined_call_operand.vmem [shape: f32[2,1,256], index: 3, kind: input, shape index: {}]   ;;  %s953_s4 = inlined_call_operand.hbm [shape: f32[2,1,256], index: 4, kind: output, shape index: {}]  }
   0x1   :  { %11 = vsyncpa [#allocation3 + $0x1], 0  ;;  %s804_s15 = smov 0   ;;  %s806_s16 = smov 0  }
   0x2   :  { %s808_s17 = smov 0   ;;  %s810_s18 = smov 0  }
   0x3   :  { %s812_s19 = smov 0   ;;  %s814_s20 = smov 0  }
   0x4 LB: > { %s611_s21 = sadd.s32 4294967295, %s774_s20   ;;  %s612_s22 = sadd.s32 4294967294, %s774_s20   ;;  %s774_s20 = sphi %s814_s20, %s17_s20   ;;  %s770_s19 = sphi %s812_s19, %s960_s19   ;;  %s766_s18 = sphi %s810_s18, %s959_s18   ;;  %s762_s17 = sphi %s808_s17, %s958_s17   ;;  %s758_s16 = sphi %s806_s16, %s957_s16   ;;  %s754_s15 = sphi %s804_s15, %s956_s15  }
   0x5   : > { %s29_s23 = sadd.s32 1, %s770_s19  ;;  %s150_s24 = sadd.s32 1, %s762_s17 }
   0x6   : > { %p31_p0 = scmp.ge.s32.totalorder %s29_s23, 2  ;;  %p160_p1 = scmp.ne.s32.totalorder %s762_s17, %s758_s16 }
   0x7   : > { %p161_p2 = scmp.eq.s32.totalorder %s611_s21, 1  ;;  %p166_p3 = scmp.ne.s32.totalorder %s758_s16, %s754_s15 }
   0x8   : > { %s962_s23 = smov (%p31_p0, %s29_s23), 0  ;;  %p167_p5 = scmp.eq.s32.totalorder %s612_s22, 1 }
   0x9   : > { %p844_p4 = por %p161_p2, %p160_p1  ;;  %s145_s26 = ssub.s32 %s770_s19, %s962_s23 }
   0xa   : > { %p615_p6 = scmp.ge.s32.totalorder %s774_s20, 1  ;;  %p148_p7 = scmp.eq.s32.totalorder %s145_s26, 0 }
   0xb   : > { %p851_p8 = por %p167_p5, %p166_p3  ;;  %p235_p9 = scmp.lt.s32.totalorder %s774_s20, 3 }
   0xc   : > { %s857_s28 = scalar_select %p148_p7, %s762_s17, %s150_s24  }
   0xd   : > { %p236_p10 = pnand %p615_p6, %p235_p9 }
   0xe   : > { %p291_p11 = scmp.lt.s32.totalorder (!%p236_p10), %s766_s18, 1  ;;  %s287_s26 = sand.u32 (!%p236_p10), 1, %s758_s16  }
   0xf   : > { %239 = sbr.rel (%p236_p10) target bundleno = 126 (0x7e), region = 36  ;;  %s471_s10 = scalar_lea.sflag (!%p236_p10), [#allocation3], %s287_s26 }
  0x10   : > { %s778_s12 = smov (!%p236_p10), [#allocation2]  }
  0x14   : > { %s861_s29 = scalar_select %p291_p11, %s766_s18, 1  ;;  %vm333_vm0 = vcmask 1044480   ;;  %v376_v20 = vlaneseq  ;;  %v776_v58 = vmov 0.0  }
  0x16   : > { %s630_s30 = sshll.u32 %s861_s29, 4  ;;  %s621_s8 = sshll.u32 %s861_s29, 1  ;;  %v873_v21 = vshrl.u32 %v376_v20, 7  ;;  %vm467_vm3 = vcmp.lt.s32.totalorder %v376_v20, 256 }
  0x17   : > { %s298_s7 = scalar_lea.vmem %s949_s0, %s630_s30  ;;  %s317_s11 = scalar_lea.vmem %s951_s2, %s621_s8 }
  0x18   : > { %v329_v0 = vld [vmem:[%s298_s7] sm:$0x1f]  ;;  %v330_v1 = vld [vmem:[%s298_s7 + $0x8] sm:$0x1f]  ;;  %v380_v22 = vsub.s32 0, %v873_v21  ;;  %v384_v24 = vsub.s32 1, %v873_v21  ;;  %s308_s14 = scalar_lea.vmem %s950_s1, %s630_s30  ;;  %s326_s24 = scalar_lea.vmem %s952_s3, %s621_s8 }
  0x19   : > { %v334_v2 = vsel %vm333_vm0, %v329_v0, -inf  ;;  %v341_v3 = vsel %vm333_vm0, %v330_v1, -inf  ;;  %v331_v23 = vld [vmem:[%s317_s11] sm:$0x3]  ;;  %v389_v36 = vld [vmem:[%s308_s14 + $0x8] sm:$0x1f] }
  0x1a   : > { %v335_v4 = vrot.slane %v334_v2, 4  ;;  %v342_v5 = vrot.slane %v341_v3, 4  ;;  %v381_v26 = vrot.slane %v331_v23, %v380_v22  ;;  %v385_v29 = vrot.slane %v331_v23, %v384_v24  ;;  %v388_v34 = vld [vmem:[%s308_s14] sm:$0x1f]  ;;  %s616_s29 = sshll.u32 %s287_s26, 1  ;;  %s632_s30 = sshll.u32 %s766_s18, 5 }
  0x1b   : > { %s289_s5 = scalar_lea.vmem [#allocation2], %s616_s29  ;;  %s485_s9 = scalar_lea.hbm %s953_s4, %s632_s30 }
  0x1c   : > { %v336_v6 = vmax.f32 %v334_v2, %v335_v4  ;;  %v343_v7 = vmax.f32 %v341_v3, %v342_v5  ;;  %vm386_vm1 = vcmp.eq.s32.totalorder %v873_v21, %v381_v26  ;;  %vm387_vm2 = vcmp.eq.s32.totalorder %v873_v21, %v385_v29  ;;  %s487_s6 = sshll.u32 %s289_s5, 4  ;;  %s702_s18 = sshll.u32 %s778_s12, 4  ;;  %s488_s6 = int_to_ptr.vmem [resolvable:$true] %s487_s6  ;;  %s703_s18 = int_to_ptr.vmem [resolvable:$false] %s702_s18 }
  0x1d   : > { %v390_v39 = vsel %vm386_vm1, %v388_v34, 0.0  ;;  %v391_v41 = vsel %vm387_vm2, %v389_v36, 0.0  ;;  %v623_v59 = vsel %vm386_vm1, 1.0, %v776_v58  ;;  %v624_v62 = vsel %vm387_vm2, 1.0, %v776_v58  ;;  %s698_s11 = scalar_lea.vmem %s488_s6, 32  ;;  %s704_s13 = scalar_lea.vmem %s703_s18, 64 }
  0x1e   : > { %v337_v8 = vrot.slane %v336_v6, 2  ;;  %v344_v9 = vrot.slane %v343_v7, 2  ;;  %v392_v44 = vsel %vm333_vm0, %v390_v39, 0.0  ;;  %v399_v46 = vsel %vm333_vm0, %v391_v41, 0.0  ;;  %p699_p12 = scmp.ne.s32.totalorder %s488_s6, %s698_s11  ;;  %p705_p1 = scmp.lt.s32.totalorder %s488_s6, %s703_s18 }
  0x1f   : > { %v393_v49 = vrot.slane %v392_v44, 4  ;;  %v400_v50 = vrot.slane %v399_v46, 4  ;;  %v425_v4 = vadd.f32 1e-06, %v623_v59  ;;  %p706_p2 = scmp.lt.s32.totalorder %s704_s13, %s698_s11 }
  0x20   : > { %v338_v10 = vmax.f32 %v336_v6, %v337_v8  ;;  %v345_v11 = vmax.f32 %v343_v7, %v344_v9  ;;  %v426_v6 = vadd.f32 1e-06, %v624_v62  ;;  %p700_p13 = pnand %p699_p12, %p844_p4 }
  0x21   : > { %v394_v51 = vadd.f32 %v393_v49, %v392_v44  ;;  %v401_v52 = vadd.f32 %v400_v50, %v399_v46  ;;  %p707_p3 = por %p706_p2, %p705_p1 }
  0x22   : > { %v339_v12 = vrot.slane %v338_v10, 1  ;;  %v346_v13 = vrot.slane %v345_v11, 1  ;;  %p701_p0 = pneg %p700_p13 }
  0x23   : > { %v395_v53 = vrot.slane %v394_v51, 2  ;;  %v402_v54 = vrot.slane %v401_v52, 2 }
  0x24   : > { %v340_v14 = vmax.f32 %v338_v10, %v339_v12  ;;  %v347_v15 = vmax.f32 %v345_v11, %v346_v13  ;;  %p708_p5 = pnand %p707_p3, %p701_p0 }
  0x25   : > { %v396_v55 = vadd.f32 %v395_v53, %v394_v51  ;;  %v403_v56 = vadd.f32 %v402_v54, %v401_v52 }
  0x26   : > { %v348_v16 = vsub.f32 %v329_v0, %v340_v14  ;;  %v349_v17 = vsub.f32 %v330_v1, %v347_v15  ;;  %v332_v1 = vld [vmem:[%s326_s24] sm:$0x3] }
  0x27   : > { %v397_v0 = vrot.slane %v396_v55, 1  ;;  %v404_v3 = vrot.slane %v403_v56, 1  ;;  %v410_v10 = vrot.slane %v332_v1, %v380_v22  ;;  %v414_v12 = vrot.slane %v332_v1, %v384_v24 }
  0x28   : > { %v350_v18 = vmul.f32 1.442695, %v348_v16  ;;  %v352_v19 = vmul.f32 1.442695, %v349_v17  ;;  %v777_v22 = vmov 1966171168  }
  0x29   : > { %v398_v9 = vadd.f32 %v397_v0, %v396_v55  ;;  %v405_v11 = vadd.f32 %v404_v3, %v403_v56 }
  0x2a   : > { %690 = vpow2.f32 %v350_v18 }
  0x2b   : > { %692 = vpow2.f32 %v352_v19  ;;  %v417_v16 = vsub.f32 %v398_v9, %v410_v10  ;;  %v418_v19 = vsub.f32 %v405_v11, %v414_v12 }
  0x2d   : > { %v420_v29 = vand.u32 2147483647, %v418_v19 }
  0x2f   : > { %v444_v36 = vmul.f32 0.25, %v420_v29 }
  0x37   : > { %v691_v25 = vpop.eup %690 }
  0x38   : > { %v693_v27 = vpop.eup %692  ;;  %v354_v28 = vsel %vm333_vm0, %v691_v25, 0.0 }
  0x39   : > { %v355_v30 = vrot.slane %v354_v28, 4  ;;  %v361_v31 = vsel %vm333_vm0, %v693_v27, 0.0 }
  0x3a   : > { %v362_v32 = vrot.slane %v361_v31, 4 }
  0x3b   : > { %v356_v33 = vadd.f32 %v355_v30, %v354_v28 }
  0x3c   : > { %v363_v35 = vadd.f32 %v362_v32, %v361_v31  ;;  %v451_v31 = vunpack.c.l.s4 %v777_v22 }
  0x3d   : > { %v357_v37 = vrot.slane %v356_v33, 2 }
  0x3e   : > { %v364_v38 = vrot.slane %v363_v35, 2 }
  0x3f   : > { %v358_v40 = vadd.f32 %v357_v37, %v356_v33  ;;  %v452_v37 = vunpack.c.0.s8 %v451_v31 }
  0x40   : > { %v365_v42 = vadd.f32 %v364_v38, %v363_v35 }
  0x41   : > { %v359_v43 = vrot.slane %v358_v40, 1 }
  0x42   : > { %v366_v45 = vrot.slane %v365_v42, 1 }
  0x43   : > { %v360_v47 = vadd.f32 %v359_v43, %v358_v40 }
  0x44   : > { %v367_v48 = vadd.f32 %v366_v45, %v365_v42  ;;  %v455_v42 = vsub.s32 %v452_v37, %v873_v21 }
  0x45   : > { %694 = vrcp.f32 %v360_v47 }
  0x46   : > { %696 = vrcp.f32 %v367_v48 }
  0x52   : > { %v695_v57 = vpop.eup %694 }
  0x53   : > { %v697_v60 = vpop.eup %696  ;;  %v370_v61 = vmul.f32 %v695_v57, %v691_v25 }
  0x54   : > { %v371_v63 = vmul.f32 %v697_v60, %v693_v27  ;;  %v419_v27 = vand.u32 2147483647, %v417_v16 }
  0x55   : > { %v372_v2 = vsub.f32 1.0, %v370_v61 }
  0x56   : > { %v373_v5 = vsub.f32 1.0, %v371_v63  ;;  %v443_v34 = vmul.f32 0.25, %v419_v27 }
  0x57   : > { %v374_v7 = vmul.f32 %v372_v2, %v372_v2 }
  0x58   : > { %v375_v8 = vmul.f32 %v373_v5, %v373_v5 }
  0x59   : > { %v427_v13 = vmul.f32 %v425_v4, %v374_v7 }
  0x5a   : > { %v428_v14 = vmul.f32 %v426_v6, %v375_v8 }
  0x5b   : > { %v429_v15 = vsel %vm333_vm0, %v427_v13, 0.0 }
  0x5c   : > { %v430_v17 = vrot.slane %v429_v15, 4  ;;  %v436_v18 = vsel %vm333_vm0, %v428_v14, 0.0 }
  0x5d   : > { %v437_v23 = vrot.slane %v436_v18, 4 }
  0x5e   : > { %v431_v25 = vadd.f32 %v430_v17, %v429_v15 }
  0x5f   : > { %v438_v26 = vadd.f32 %v437_v23, %v436_v18 }
  0x60   : > { %v432_v28 = vrot.slane %v431_v25, 2 }
  0x61   : > { %v439_v30 = vrot.slane %v438_v26, 2 }
  0x62   : > { %v433_v24 = vadd.f32 %v432_v28, %v431_v25 }
  0x63   : > { %v440_v32 = vadd.f32 %v439_v30, %v438_v26 }
  0x64   : > { %v434_v33 = vrot.slane %v433_v24, 1 }
  0x65   : > { %v441_v35 = vrot.slane %v440_v32, 1 }
  0x66   : > { %v435_v38 = vadd.f32 %v434_v33, %v433_v24 }
  0x67   : > { %v442_v39 = vadd.f32 %v441_v35, %v440_v32 }
  0x68   : > { %v445_v40 = vmul.f32 %v443_v34, %v435_v38 }
  0x69   : > { %v446_v41 = vmul.f32 %v444_v36, %v442_v39 }
  0x6b   : > { %v449_v43 = vcombine.low %v445_v40, %v446_v41 }
  0x6d   : > { %v456_v44 = vrot.slane %v449_v43, %v455_v42 }
  0x6f   : > { %v463_v45 = vrot.slane %v456_v44, %v455_v42 }
  0x71   : > { %469 = vst.msk [vmem:[%s289_s5] sm:$0x3] %vm467_vm3, %v463_v45 }
  0x72   : > { %711 = shalt.err (!%p708_p5)
}
  0x73   : > { %s712_s14 = scalar_lea.hbm %s485_s9, 32  ;;  %s716_s24 = scalar_lea.hbm %s953_s4, 64 }
  0x74   : > { %p713_p6 = scmp.ne.s32.totalorder %s485_s9, %s712_s14  ;;  %p717_p10 = scmp.lt.s32.totalorder %s485_s9, %s953_s4 }
  0x75   : > { %p718_p11 = scmp.lt.s32.totalorder %s716_s24, %s712_s14 }
  0x76   : > { %p714_p7 = pnand %p713_p6, %p844_p4 }
  0x77   : > { %p719_p12 = por %p718_p11, %p717_p10 }
  0x78   : > { %p715_p9 = pneg %p714_p7 }
  0x7a   : > { %p720_p13 = pnand %p719_p12, %p715_p9 }
  0x7c   : > { %723 = shalt.err (!%p720_p13)
}
  0x7d   : > { %633 = dma.vmem_to_hbm [thread:$0]  (%p844_p4), %s488_s6, 32, %s485_s9, %s471_s10  }
  0x7e PF: > { %p639_p0 = scmp.ge.s32.totalorder %s774_s20, 2  ;;  %s499_s30 = sand.u32 1, %s754_s15  }
  0x7f   : > { %s500_s5 = scalar_lea.sflag [#allocation3], %s499_s30 }
  0x80   : > { %p636_p1 = pnand %p639_p0, %p851_p8 }
  0x82   : > { %p637_p2 = pneg %p636_p1 }
  0x84   : > { %749 = dma.done.wait (%p637_p2), %s500_s5, 32  }
  0x85   : > { %751 = vsyncadd (%p637_p2), %s500_s5, 4294967264  ;;  %s17_s20 = sadd.s32 1, %s774_s20   ;;  %s956_s15 = smov %s758_s16 }
  0x86   : > { %p14_p3 = scmp.ge.s32.totalorder %s17_s20, 4   ;;  %s957_s16 = smov %s762_s17 }
  0x87   : > { %s958_s17 = smov %s857_s28  ;;  %s959_s18 = smov %s770_s19 }
  0x88   : > { %s960_s19 = smov %s962_s23  ;;  %16 = sbr.rel (!%p14_p3) target bundleno = 4 (0x4), region = 80 }
  0x8d   :  { %505 = vsyncpa [#allocation3], 1 }
  0x8e   :  { %507 = vsyncpa [#allocation3 + $0x1], 1 }

</bundles_post_ra>
